<compile_context>
chip_gen: v6e
topology: v6e:2x2x1
jax: 0.10.0
libtpu: 0.0.40
codegen_flags: <defaults>
</compile_context>

<pallas_src>
import functools

import jax
import jax.numpy as jnp
from jax.experimental import pallas as pl
from jax.experimental.pallas import tpu as pltpu


def _ceil_div(a, b):
    return -(-a // b)


def _shift_pad(block, left, right):
    """Place `block` (s, L) into a (s, left + L + right) slab at lane offset `left`."""
    s = block.shape[0]
    parts = []
    if left:
        parts.append(jnp.zeros((s, left), block.dtype))
    parts.append(block)
    if right:
        parts.append(jnp.zeros((s, right), block.dtype))
    if len(parts) == 1:
        return block
    return jnp.concatenate(parts, axis=1)


def _convT1d_kernel(x_ref, w_ref, b_ref, o_ref, carry_ref, *,
                    stride, r, L_t, compute_dtype):
    """One (batch, time-tile) step of ConvTranspose1d(C -> 1).

    x_ref:     (1, C, L_t)            input tile (NCW, time in lanes)
    w_ref:     (K_pad, C)             transposed, zero-padded-to-r*stride weights
    b_ref:     (1, 1) f32             bias
    o_ref:     (1, stride, L_t) f32   phase-major output frames owned by this tile
    carry_ref: (stride, max(r-1, 1))  f32 cross-tile carry (VMEM scratch)
    """
    s = stride
    t = pl.program_id(1)

    # Lane-dense matmul on the MXU: (r*s, C) @ (C, L_t) -> (r*s, L_t), f32 acc.
    x = x_ref[0].astype(compute_dtype)
    p = jnp.dot(w_ref[...], x, preferred_element_type=jnp.float32)

    if r == 1:
        # No tap overlap: each output frame comes from exactly one input column.
        o_ref[0] = p + b_ref[...]
        return

    # Reset the cross-tile carry at the start of each batch row.
    @pl.when(t == 0)
    def _():
        carry_ref[...] = jnp.zeros_like(carry_ref)

    # Overlap-add in registers (phase-major): acc[m, f] = sum_j p[j*s + m, f - j].
    # r = ceil(K/stride) is tiny and static -> cheap unrolled shifted adds.
    acc = _shift_pad(p[0:s, :], 0, r - 1)
    for j in range(1, r):
        acc = acc + _shift_pad(p[j * s:(j + 1) * s, :], j, r - 1 - j)
    # Frames at the start of this tile also receive the previous tile's tail.
    acc = acc + _shift_pad(carry_ref[...], 0, L_t)

    # Single contiguous lane-dense store of this tile's owned frames (+ bias).
    o_ref[0] = acc[:, :L_t] + b_ref[...]
    # Tail frames spill into the next tile's frame range.
    carry_ref[...] = acc[:, L_t:]


@functools.partial(jax.jit,
                   static_argnames=("stride", "init_len", "tile", "compute_dtype"))
def conv_transpose1d_pallas(x, w, b, *, stride, init_len, tile=2048,
                            compute_dtype=jnp.bfloat16):
    """ConvTranspose1d(C -> 1, kernel K, stride) sliced to init_len.

    x: (B, C, L) f32 (NCW, as produced by the encoder); w: (C, K); b: (1,) f32.
    Returns (B, min(init_len, L_out)) f32 with L_out = (L-1)*stride + K.
    """
    B, C, L = x.shape
    K = w.shape[-1]
    s = stride
    L_out = (L - 1) * s + K
    n_valid = min(init_len, L_out)          # PyTorch's [:, :init_len] clamps
    r = _ceil_div(K, s)                     # taps contributing to each output frame
    K_pad = r * s

    F_valid = _ceil_div(n_valid, s)         # output frames actually needed
    if F_valid <= tile:
        L_t, T = F_valid, 1                 # single tile: last dim == full array dim
    else:
        L_t, T = tile, _ceil_div(F_valid, tile)   # tile is a multiple of 128
    F_pad = T * L_t

    # Trim (init_len < L_out) or zero-pad the time axis to an exact number of tiles.
    if F_pad == L:
        x_in = x
    elif F_pad < L:
        x_in = x[:, :, :F_pad]
    else:
        x_in = jnp.pad(x, ((0, 0), (0, 0), (0, F_pad - L)))

    # Weight as (K_pad, C), zero-padded taps, in the compute dtype (tiny, done once).
    w_kc = jnp.zeros((K_pad, C), compute_dtype).at[:K, :].set(
        w.T.astype(compute_dtype))
    b2 = b.reshape(1, 1).astype(jnp.float32)

    kernel = functools.partial(_convT1d_kernel, stride=s, r=r, L_t=L_t,
                               compute_dtype=compute_dtype)
    out_phase = pl.pallas_call(
        kernel,
        out_shape=jax.ShapeDtypeStruct((B, s, F_pad), jnp.float32),
        grid=(B, T),
        in_specs=[
            pl.BlockSpec((1, C, L_t), lambda bi, ti: (bi, 0, ti)),   # input tile
            pl.BlockSpec((K_pad, C), lambda bi, ti: (0, 0)),         # weights
            pl.BlockSpec((1, 1), lambda bi, ti: (0, 0)),             # bias
        ],
        out_specs=pl.BlockSpec((1, s, L_t), lambda bi, ti: (bi, 0, ti)),
        scratch_shapes=[
            pltpu.VMEM((s, max(r - 1, 1)), jnp.float32),  # cross-tile carry
        ],
        compiler_params=pltpu.CompilerParams(
            dimension_semantics=("parallel", "arbitrary")),
    )(x_in, w_kc, b2)

    # Phase-major (B, s, F) -> time-major (B, F*s), then slice to init_len.
    out = jnp.transpose(out_phase, (0, 2, 1)).reshape(B, F_pad * s)
    return out[:, :n_valid]


class SpeechDecoderPallas:
    """JAX/Pallas port of SpexPlus SpeechDecoder (three ConvTranspose1d -> 1ch heads)."""

    def __init__(self, n_channels, short_kernel, middle_kernel, long_kernel, key):
        self.n_channels = n_channels
        self.stride = short_kernel // 2
        self.kernels = (short_kernel, middle_kernel, long_kernel)
        ks = jax.random.split(key, 6)
        self.params = []
        for idx, K in enumerate(self.kernels):
            w = 0.1 * jax.random.normal(ks[2 * idx], (n_channels, K), jnp.float32)
            b = 0.1 * jax.random.normal(ks[2 * idx + 1], (1,), jnp.float32)
            self.params.append((w, b))

    def forward(self, encs1, encs2, encs3, init_len):
        # TODO(synk): fusing the three heads into one pallas_call (grid axis over
        # decoders) would amortize launch overhead, but requires stacking the three
        # distinct encoder tensors in HBM (an extra full-input copy); kept as three
        # calls whose grids are already batch/tile-parallel.
        outs = []
        for x, (w, b) in zip((encs1, encs2, encs3), self.params):
            outs.append(conv_transpose1d_pallas(
                x, w, b, stride=self.stride, init_len=init_len))
        return tuple(outs)


def _reference_convT1d(x, w, b, stride, init_len, cast_dtype=jnp.float32):
    """Pure-JAX ConvTranspose1d(C->1) reference, optionally with bf16 input rounding."""
    B, C, L = x.shape
    K = w.shape[1]
    L_out = (L - 1) * stride + K
    xc = x.astype(cast_dtype).astype(jnp.float32)
    wc = w.astype(cast_dtype).astype(jnp.float32)
    out = jnp.zeros((B, L_out), jnp.float32) + b[0]
    for i in range(L):
        out = out.at[:, i * stride:i * stride + K].add(xc[:, :, i] @ wc)
    return out[:, :min(init_len, L_out)]


if __name__ == "__main__":
    key = jax.random.PRNGKey(0)
    k_params, k1, k2, k3, k4 = jax.random.split(key, 5)

    n_channels = 4
    short_kernel, middle_kernel, long_kernel = 4, 8, 16
    B, L = 2, 8
    init_len = 16

    dec = SpeechDecoderPallas(n_channels, short_kernel, middle_kernel, long_kernel,
                              k_params)

    encs1 = jax.random.normal(k1, (B, n_channels, L), jnp.float32)
    encs2 = jax.random.normal(k2, (B, n_channels, L), jnp.float32)
    encs3 = jax.random.normal(k3, (B, n_channels, L), jnp.float32)

    s1, s2, s3 = dec.forward(encs1, encs2, encs3, init_len)
    jax.block_until_ready((s1, s2, s3))

    stride = short_kernel // 2
    for got, x, (w, b) in zip((s1, s2, s3), (encs1, encs2, encs3), dec.params):
        assert got.shape == (B, init_len), got.shape
        # bf16-consistent reference (same input/weight rounding as the kernel).
        ref_bf = _reference_convT1d(x, w, b, stride, init_len, jnp.bfloat16)
        assert jnp.allclose(got, ref_bf, atol=1e-4, rtol=1e-4), "mismatch vs bf16 ref"
        # f32 reference sanity check (bf16-matmul tolerance).
        ref_f32 = _reference_convT1d(x, w, b, stride, init_len, jnp.float32)
        assert jnp.allclose(got, ref_f32, atol=5e-2, rtol=5e-2), "mismatch vs f32 ref"

    # Exercise the multi-tile (time-grid + cross-tile carry) path with a 128-frame tile.
    L_big, init_big = 300, 600
    x_big = jax.random.normal(k4, (B, n_channels, L_big), jnp.float32)
    w0, b0 = dec.params[0]
    got_big = conv_transpose1d_pallas(x_big, w0, b0, stride=stride,
                                      init_len=init_big, tile=128)
    jax.block_until_ready(got_big)
    ref_big = _reference_convT1d(x_big, w0, b0, stride, init_big, jnp.bfloat16)
    assert got_big.shape == ref_big.shape, (got_big.shape, ref_big.shape)
    assert jnp.allclose(got_big, ref_big, atol=1e-4, rtol=1e-4), "multi-tile mismatch"

    print("KERNEL_OK")
</pallas_src>

<mosaic_0001>
module attributes {stable_mosaic.version = 11 : i64} {
  func.func @_convT1d_kernel(%arg0: i32, %arg1: i32, %arg2: memref<1x4x8xf32, #tpu.memory_space<vmem>>, %arg3: memref<4x4xbf16, #tpu.memory_space<vmem>>, %arg4: memref<1x1xf32, #tpu.memory_space<vmem>>, %arg5: memref<1x2x8xf32, #tpu.memory_space<vmem>>, %arg6: memref<2x1xf32, #tpu.memory_space<vmem>>) attributes {dimension_semantics = [#tpu.dimension_semantics<parallel>, #tpu.dimension_semantics<arbitrary>], iteration_bounds = array<i64: 2, 1>, scalar_prefetch = 0 : i64, scratch_operands = 1 : i64, tpu.core_type = #tpu.core_type<tc>, window_params = [{transform_indices = @transform_0, window_bounds = array<i64: 1, 4, 8>}, {pipeline_mode = #tpu.pipeline_mode<synchronous>, transform_indices = @transform_1, window_bounds = array<i64: 4, 4>}, {pipeline_mode = #tpu.pipeline_mode<synchronous>, transform_indices = @transform_2, window_bounds = array<i64: 1, 1>}, {transform_indices = @transform_3, window_bounds = array<i64: 1, 2, 8>}]} {
    %c0 = arith.constant 0 : index
    %c0_0 = arith.constant 0 : index
    %c0_1 = arith.constant 0 : index
    %0 = vector.load %arg2[%c0, %c0_0, %c0_1] : memref<1x4x8xf32, #tpu.memory_space<vmem>>, vector<1x4x8xf32>
    %1 = vector.shape_cast %0 : vector<1x4x8xf32> to vector<4x8xf32>
    %2 = arith.truncf %1 : vector<4x8xf32> to vector<4x8xbf16>
    %c0_2 = arith.constant 0 : index
    %c0_3 = arith.constant 0 : index
    %3 = vector.load %arg3[%c0_2, %c0_3] : memref<4x4xbf16, #tpu.memory_space<vmem>>, vector<4x4xbf16>
    %cst = arith.constant dense<0.000000e+00> : vector<4x8xf32>
    %4 = tpu.matmul %3, %2, %cst {dimension_numbers = #tpu.dot_dimension_numbers<[1], [0], [0], [1], [0, 0, 1, 1], [], []>} : vector<4x4xbf16>, vector<4x8xbf16>, vector<4x8xf32> -> vector<4x8xf32>
    %c0_i32 = arith.constant 0 : i32
    %5 = arith.cmpi eq, %arg1, %c0_i32 : i32
    %6 = arith.extui %5 : i1 to i32
    %c0_i32_4 = arith.constant 0 : i32
    %7 = arith.cmpi ne, %6, %c0_i32_4 : i32
    scf.if %7 {
      %cst_17 = arith.constant 0.000000e+00 : f32
      %28 = vector.broadcast %cst_17 : f32 to vector<2x1xf32>
      %c0_18 = arith.constant 0 : index
      %c0_19 = arith.constant 0 : index
      %29 = vector.load %arg6[%c0_18, %c0_19] : memref<2x1xf32, #tpu.memory_space<vmem>>, vector<2x1xf32>
      tpu.vector_store %arg6[%c0_18, %c0_19], %28 {strides = array<i32>} : memref<2x1xf32, #tpu.memory_space<vmem>>, vector<2x1xf32>,
    } else {
    }
    %8 = vector.extract_strided_slice %4 {offsets = [0, 0], sizes = [2, 8], strides = [1, 1]} : vector<4x8xf32> to vector<2x8xf32>
    %cst_5 = arith.constant 0.000000e+00 : f32
    %9 = vector.broadcast %cst_5 : f32 to vector<2x1xf32>
    %10 = tpu.concatenate %8, %9 in 1 : vector<2x8xf32>, vector<2x1xf32> -> vector<2x9xf32>
    %11 = vector.extract_strided_slice %4 {offsets = [2, 0], sizes = [2, 8], strides = [1, 1]} : vector<4x8xf32> to vector<2x8xf32>
    %cst_6 = arith.constant 0.000000e+00 : f32
    %12 = vector.broadcast %cst_6 : f32 to vector<2x1xf32>
    %13 = tpu.concatenate %12, %11 in 1 : vector<2x1xf32>, vector<2x8xf32> -> vector<2x9xf32>
    %14 = arith.addf %10, %13 : vector<2x9xf32>
    %c0_7 = arith.constant 0 : index
    %c0_8 = arith.constant 0 : index
    %15 = vector.load %arg6[%c0_7, %c0_8] : memref<2x1xf32, #tpu.memory_space<vmem>>, vector<2x1xf32>
    %cst_9 = arith.constant 0.000000e+00 : f32
    %16 = vector.broadcast %cst_9 : f32 to vector<2x8xf32>
    %17 = tpu.concatenate %15, %16 in 1 : vector<2x1xf32>, vector<2x8xf32> -> vector<2x9xf32>
    %18 = arith.addf %14, %17 : vector<2x9xf32>
    %19 = vector.extract_strided_slice %18 {offsets = [0, 0], sizes = [2, 8], strides = [1, 1]} : vector<2x9xf32> to vector<2x8xf32>
    %c0_10 = arith.constant 0 : index
    %c0_11 = arith.constant 0 : index
    %20 = vector.load %arg4[%c0_10, %c0_11] : memref<1x1xf32, #tpu.memory_space<vmem>>, vector<1x1xf32>
    %21 = vector.broadcast %20 : vector<1x1xf32> to vector<2x8xf32>
    %22 = arith.addf %19, %21 : vector<2x8xf32>
    %c0_12 = arith.constant 0 : index
    %c0_13 = arith.constant 0 : index
    %c0_14 = arith.constant 0 : index
    %23 = vector.load %arg5[%c0_12, %c0_13, %c0_14] : memref<1x2x8xf32, #tpu.memory_space<vmem>>, vector<1x2x8xf32>
    %24 = vector.shape_cast %23 : vector<1x2x8xf32> to vector<2x8xf32>
    %25 = vector.shape_cast %22 : vector<2x8xf32> to vector<1x2x8xf32>
    tpu.vector_store %arg5[%c0_12, %c0_13, %c0_14], %25 {strides = array<i32>} : memref<1x2x8xf32, #tpu.memory_space<vmem>>, vector<1x2x8xf32>,
    %26 = vector.extract_strided_slice %18 {offsets = [0, 8], sizes = [2, 1], strides = [1, 1]} : vector<2x9xf32> to vector<2x1xf32>
    %c0_15 = arith.constant 0 : index
    %c0_16 = arith.constant 0 : index
    %27 = vector.load %arg6[%c0_15, %c0_16] : memref<2x1xf32, #tpu.memory_space<vmem>>, vector<2x1xf32>
    tpu.vector_store %arg6[%c0_15, %c0_16], %26 {strides = array<i32>} : memref<2x1xf32, #tpu.memory_space<vmem>>, vector<2x1xf32>,
    return
  }
  func.func @transform_0(%arg0: i32, %arg1: i32) -> (i32, i32, i32) {
    %c0_i32 = arith.constant 0 : i32
    %c0_i32_0 = arith.constant 0 : i32
    return %arg0, %c0_i32, %arg1 : i32, i32, i32
  }
  func.func @transform_1(%arg0: i32, %arg1: i32) -> (i32, i32) {
    %c0_i32 = arith.constant 0 : i32
    %c0_i32_0 = arith.constant 0 : i32
    %c0_i32_1 = arith.constant 0 : i32
    return %c0_i32, %c0_i32_0 : i32, i32
  }
  func.func @transform_2(%arg0: i32, %arg1: i32) -> (i32, i32) {
    %c0_i32 = arith.constant 0 : i32
    %c0_i32_0 = arith.constant 0 : i32
    %c0_i32_1 = arith.constant 0 : i32
    return %c0_i32, %c0_i32_0 : i32, i32
  }
  func.func @transform_3(%arg0: i32, %arg1: i32) -> (i32, i32, i32) {
    %c0_i32 = arith.constant 0 : i32
    %c0_i32_0 = arith.constant 0 : i32
    return %arg0, %c0_i32, %arg1 : i32, i32, i32
  }
}

</mosaic_0001>

<bundles_post_ra>
// kernel: conv_transpose1d_pallas.1
= control target key start
LH: loop header
LB: loop body
LE: loop exit
PB: predicated region body
PF: predicated region fallthrough
CT: control target
= control target key end

     0   :  { %s464_s14 = smov 0   ;;  %s466_s15 = smov 0   ;;  %s506_s0 = inlined_call_operand.vmem [shape: f32[2,4,8], index: 0, kind: input, shape index: {}]   ;;  %s507_s1 = inlined_call_operand.vmem [shape: bf16[4,4], index: 1, kind: input, shape index: {}]   ;;  %s508_s2 = inlined_call_operand.<no memory space> [shape: f32[1,1], index: 2, kind: input, shape index: {}]   ;;  %s509_s3 = inlined_call_operand.vmem [shape: f32[2,2,8], index: 3, kind: output, shape index: {}]  }
   0x1   :  { %v8_v0 = vstv %s508_s2  ;;  %s468_s16 = smov 0  }
   0x2   :  { %9 = vst [vmem:[#allocation3] sm:$0x1] %v8_v0 }
   0x3 LB: > { %s27_s2 = sadd.s32 1, %s430_s15  ;;  %p367_p0 = scmp.ge.s32.totalorder %s434_s16, 1  ;;  %s434_s16 = sphi %s468_s16, %s15_s16   ;;  %s430_s15 = sphi %s466_s15, %s511_s15   ;;  %s426_s14 = sphi %s464_s14, %s510_s14  }
   0x4   : > { %p29_p1 = scmp.ge.s32.totalorder %s27_s2, 2  ;;  %p157_p2 = scmp.lt.s32.totalorder %s434_s16, 3 }
   0x6   : > { %s513_s2 = smov (%p29_p1, %s27_s2), 0  ;;  %p158_p3 = pnand %p367_p0, %p157_p2 }
   0x7   : > { %p185_p4 = scmp.lt.s32.totalorder (!%p158_p3), %s426_s14, 1  ;;  %s439_s23 = smov (!%p158_p3), 1  }
   0x8   : > { %161 = sbr.rel (%p158_p3) target bundleno = 454 (0x1c6), region = 32  ;;  %s440_s24 = smov (!%p158_p3), 120  }
   0xd   : > { %vm255_vm0 = vcmask 1024   ;;  %v436_v1 = vmov 0.0   ;;  %vm437_vm1 = vmmov 0   ;;  %s515_s14 = smov (!%p185_p4, %s426_s14), 1  ;;  %vm207_vm2 = vcmask 1041408  }
   0xe   : > { %376 = vmatprep.subr.bf16.mxu0 %v436_v1  ;;  %256 = vst.msk [vmem:[#allocation2] sm:$0x3] %vm255_vm0, %v436_v1  ;;  %378 = vmatprep.mubr.msk.bf16.mxu0 %vm437_vm1, %v436_v1  ;;  %s368_s17 = sshll.u32 %s515_s14, 2  ;;  %v202_v5 = vld [vmem:[%s507_s1] sm:$0x3]  ;;  %vm203_vm3 = vcmask 31744  }
   0xf   : > { %s191_s20 = scalar_lea.vmem %s506_s0, %s368_s17  ;;  %v438_v6 = vmov 0   ;;  %v371_v11 = vld [vmem:[#allocation3] ss:$0 sm:$0xff]  ;;  %vm257_vm4 = vcmask 64512   ;;  %vm264_vm5 = vcmask 7168   ;;  %s369_s25 = sshll.u32 %s515_s14, 1 }
  0x10   : > { %v200_v2 = vld [vmem:[%s191_s20] sm:$0xf]  ;;  %411 = vset.pattern.permute.xlu0 %v438_v6  ;;  %s198_s28 = scalar_lea.vmem %s509_s3, %s369_s25  ;;  %vm281_vm6 = vcmask 58368  }
  0x11   : > { %v201_v3 = vpack.c.bf16 %v200_v2, %v200_v2 }
  0x13   : > { %v209_v4 = vsel %vm207_vm2, %v201_v3, 0 }
  0x14   : > { %377 = vmatpush3.bf16.msra.mxu0 %v209_v4 }
  0x15   : > { %v267_v13 = vld [vmem:[#allocation2] sm:$0x3] }
  0x16   : > { %v268_v17 = vsel %vm264_vm5, %v267_v13, 0.0 }
  0x17   : > { %379 = vmatmul.mubr.msk.bf16.vlgmr.msra.gmra.mxu0 %vm203_vm3, %v202_v5 }
  0xd7   : > { %v245_v7 = vpop.f32.mrf.mxu0 }
  0xd8   : > { %v260_v8 = vrot.slane %v245_v7, 2  ;;  %v258_v15 = vsel %vm257_vm4, %v245_v7, 0.0 }
  0xd9   : > { %v380_v9 = vpop.f32.mrf.mxu0 }
  0xda   : > { %261 = vrot.lane.b32.xlu0 %v260_v8, %s439_s23 }
  0xdb   : > { %v248_v10 = vpop.f32.mrf.mxu0 }
  0xdd   : > { %v381_v12 = vpop.f32.mrf.mxu0 }
  0xde   : > { %277 = vperm.xlu0 %411, %v371_v11  }
 0x14c   : > { %v262_v14 = vpop.permute.xlu0 %261 }
 0x14d   : > { %v265_v16 = vsel %vm264_vm5, 0.0, %v262_v14 }
 0x14e   : > { %v266_v18 = vadd.f32 %v265_v16, %v258_v15 }
 0x150   : > { %v269_v19 = vadd.f32 %v268_v17, %v266_v18 }
 0x152   : > { %284 = vrot.lane.b32.xlu1 %v269_v19, %s440_s24 }
 0x159   : > { %v278_v20 = vpop.permute.xlu0 %277 }
 0x15a   : > { %v280_v21 = vadd.f32 %v278_v20, %v269_v19 }
 0x15c   : > { %282 = vst.msk [vmem:[%s198_s28] sm:$0x3] %vm281_vm6, %v280_v21 }
 0x1c4   : > { %v285_v22 = vpop.permute.xlu1 %284 }
 0x1c5   : > { %288 = vst.msk [vmem:[#allocation2] sm:$0x3] %vm255_vm0, %v285_v22 }
 0x1c6 PF: > { %s15_s16 = sadd.s32 1, %s434_s16   ;;  %s510_s14 = smov %s430_s15 }
 0x1c7   : > { %p12_p5 = scmp.ge.s32.totalorder %s15_s16, 4   ;;  %s511_s15 = smov %s513_s2 }
 0x1c9   :  { %14 = sbr.rel (!%p12_p5) target bundleno = 3 (0x3), region = 66 }

</bundles_post_ra>
